<compile_context>
chip_gen: v7x
topology: tpu7x:2x2x1
jax: 0.10.0
libtpu: 0.0.40
codegen_flags: <defaults>
</compile_context>

<pallas_src>
import math
import functools

import jax
import jax.numpy as jnp
from jax.experimental import pallas as pl
from jax.experimental.pallas import tpu as pltpu


def _round_up(n, m):
    return ((n + m - 1) // m) * m


def _cdiv(a, b):
    return -(-a // b)


def _activation_plan(activation, input_size, hidden_size):
    """Returns (act_fn, scale_pre, scale_post) with the 1/sqrt(D) pre-scale
    folded into the cheapest place and the 1/H mean folded post-reduction."""
    inv_sqrt_d = 1.0 / math.sqrt(float(input_size))
    inv_h = 1.0 / float(hidden_size)
    if activation == "square":
        # (s*z)^2 = s^2 * z^2  -> fold scale after the reduction.
        return (lambda z: z * z), 1.0, inv_sqrt_d * inv_sqrt_d * inv_h
    if activation == "relu":
        # max(s*z, 0) = s * max(z, 0) for s > 0 -> fold scale after reduction.
        return (lambda z: jnp.maximum(z, 0.0)), 1.0, inv_sqrt_d * inv_h
    if activation == "erf":
        # erf((z/sqrt(D)) / sqrt(2)) -> fold both scales into the pre-scale.
        return jax.lax.erf, inv_sqrt_d / math.sqrt(2.0), inv_h
    if activation == "H3":
        return (lambda z: z * z * z - 3.0 * z), inv_sqrt_d, inv_h
    raise ValueError(f"unknown activation: {activation}")


# ---------------------------------------------------------------------------
# Kernels
# ---------------------------------------------------------------------------

def _committee_kernel_2d(x_ref, w_ref, o_ref, o_acc, *, act_fn, scale_pre, scale_post):
    # x_ref: (TB, D)  w_ref: (TH, D)  o_ref: (1, TB) f32  o_acc: (1, TB) f32
    h = pl.program_id(1)

    @pl.when(h == 0)
    def _init():
        o_acc[...] = jnp.zeros_like(o_acc)

    # (TH, D) contracted with (TB, D) on D -> (TH, TB); f32 MXU accumulation.
    z = jax.lax.dot_general(
        w_ref[...],
        x_ref[...],
        dimension_numbers=(((1,), (1,)), ((), ())),
        preferred_element_type=jnp.float32,
    )
    if scale_pre != 1.0:
        z = z * scale_pre
    a = act_fn(z)
    # Reduce over the hidden (sublane) axis -> (1, TB), accumulate partial sums.
    o_acc[...] += jnp.sum(a, axis=0, keepdims=True)

    @pl.when(h == pl.num_programs(1) - 1)
    def _finalize():
        o_ref[...] = (o_acc[...] * scale_post).astype(o_ref.dtype)


def _committee_kernel_3d(x_ref, w_ref, o_ref, z_acc, o_acc, *, act_fn, scale_pre, scale_post):
    # x_ref: (TB, TK)  w_ref: (TH, TK)  o_ref: (1, TB) f32
    # z_acc: (TH, TB) f32 pre-activation accumulator over the K axis
    # o_acc: (1, TB)  f32 post-activation accumulator over the hidden axis
    h = pl.program_id(1)
    k = pl.program_id(2)
    nh = pl.num_programs(1)
    nk = pl.num_programs(2)

    @pl.when(jnp.logical_and(h == 0, k == 0))
    def _init_out():
        o_acc[...] = jnp.zeros_like(o_acc)

    @pl.when(k == 0)
    def _init_z():
        z_acc[...] = jnp.zeros_like(z_acc)

    z_acc[...] += jax.lax.dot_general(
        w_ref[...],
        x_ref[...],
        dimension_numbers=(((1,), (1,)), ((), ())),
        preferred_element_type=jnp.float32,
    )

    # Activation only after the full-D accumulation of z (correctness!).
    @pl.when(k == nk - 1)
    def _reduce():
        z = z_acc[...]
        if scale_pre != 1.0:
            z = z * scale_pre
        a = act_fn(z)
        o_acc[...] += jnp.sum(a, axis=0, keepdims=True)

    @pl.when(jnp.logical_and(k == nk - 1, h == nh - 1))
    def _finalize():
        o_ref[...] = (o_acc[...] * scale_post).astype(o_ref.dtype)


# ---------------------------------------------------------------------------
# Tile selection / wrapper
# ---------------------------------------------------------------------------

def _vmem_capacity_bytes():
    try:
        return int(pltpu.get_tpu_info().vmem_capacity_bytes)
    except Exception:
        return 64 << 20  # conservative per-core value (v7x)


def _select_tiles(B, D, H, itemsize, vmem_budget, *, tb_max=512, th_cap=512, tk_cap=2048):
    # Batch tile: at least 2 tiles for B >= 256 so the "parallel" axis feeds
    # both v7x TensorCores; single full-extent tile for small B.
    if B < 256:
        tb = B
    else:
        tb = min(tb_max, max(128, _round_up(_cdiv(B, 2), 128)))

    def block_bytes(th, tk, tiled_k):
        nbytes = 2 * (tb * tk + th * tk) * itemsize   # double-buffered x / W blocks
        nbytes += 2 * tb * 4 + tb * 4                  # out block (dbl-buf) + o_acc
        if tiled_k:
            nbytes += th * tb * 4                      # (th, tb) f32 pre-act accumulator
        return nbytes

    # Prefer th = H, tk = D: W's block index never changes -> DMA'd exactly once.
    if block_bytes(H, D, False) <= vmem_budget:
        return tb, H, D

    # Shrink the hidden tile first (keep tk = D).
    th = min(_round_up(H, 8), th_cap)
    while th > 8 and block_bytes(th, D, False) > vmem_budget:
        th = max(8, th // 2)
    if block_bytes(th, D, False) <= vmem_budget:
        return tb, th, D

    # Engage K (input_size) tiling for large D (v7x's 64 MiB VMEM).
    tk = max(128, min(_round_up(D, 128), tk_cap))
    while tk > 128 and block_bytes(th, tk, True) > vmem_budget:
        tk = max(128, tk // 2)
    return tb, th, tk


def committee_machine_forward(
    x,
    W,
    activation="square",
    *,
    compute_dtype=jnp.bfloat16,
    tb_max=512,
    th_cap=512,
    tk_cap=2048,
    _force_tiles=None,   # (tb, th, tk) testing hook
):
    """x: (batch, input_size), W: (hidden_size, input_size) -> (batch,) f32."""
    assert x.ndim == 2 and W.ndim == 2
    B, D = x.shape
    H, D2 = W.shape
    assert D == D2, "weight / input dim mismatch"

    act_fn, scale_pre, scale_post = _activation_plan(activation, D, H)
    itemsize = jnp.dtype(compute_dtype).itemsize

    vmem_cap = _vmem_capacity_bytes()
    vmem_budget = max(int(0.8 * vmem_cap) - (2 << 20), 8 << 20)

    if _force_tiles is not None:
        tb, th, tk = _force_tiles
    else:
        tb, th, tk = _select_tiles(B, D, H, itemsize, vmem_budget,
                                   tb_max=tb_max, th_cap=th_cap, tk_cap=tk_cap)

    # Clamp tiles to full extents and compute padded sizes.
    if tb >= B:
        tb, b_pad = B, B
    else:
        assert tb % 128 == 0, "tiled batch tile must be a multiple of 128"
        b_pad = _round_up(B, tb)
    if th >= H:
        th, h_pad = H, H
    else:
        assert th % 8 == 0, "tiled hidden tile must be a multiple of 8"
        h_pad = _round_up(H, th)
    if tk >= D:
        tk, d_pad = D, D
    else:
        assert tk % 128 == 0, "tiled input tile must be a multiple of 128"
        d_pad = _round_up(D, tk)

    n_bt, n_ht, n_kt = b_pad // tb, h_pad // th, d_pad // tk

    # Cast / pad only when actually required (avoid an extra HBM pass).
    xp = x if x.dtype == jnp.dtype(compute_dtype) else x.astype(compute_dtype)
    wp = W if W.dtype == jnp.dtype(compute_dtype) else W.astype(compute_dtype)
    if (b_pad, d_pad) != (B, D):
        xp = jnp.pad(xp, ((0, b_pad - B), (0, d_pad - D)))   # padded rows sliced off
    if (h_pad, d_pad) != (H, D):
        wp = jnp.pad(wp, ((0, h_pad - H), (0, d_pad - D)))   # act(0) == 0 for all acts

    # Per-step VMEM footprint and compiler limit (capped at ~0.9 * physical).
    block_bytes = 2 * (tb * tk + th * tk) * itemsize + 3 * tb * 4
    if n_kt > 1:
        block_bytes += th * tb * 4
    vmem_limit = int(min(int(0.9 * vmem_cap), max(block_bytes + (4 << 20), 32 << 20)))

    # HBM bytes actually moved: operands are re-streamed when the other side is tiled.
    x_streams = n_ht if n_kt > 1 else 1
    w_streams = n_bt if (n_ht > 1 or n_kt > 1) else 1
    cost = pl.CostEstimate(
        flops=2 * B * D * H,
        transcendentals=(B * H) if activation == "erf" else 0,
        bytes_accessed=(b_pad * d_pad * x_streams + h_pad * d_pad * w_streams) * itemsize
        + b_pad * 4,
    )

    if n_kt == 1:
        kernel = functools.partial(_committee_kernel_2d, act_fn=act_fn,
                                   scale_pre=scale_pre, scale_post=scale_post)
        grid = (n_bt, n_ht)
        in_specs = [
            pl.BlockSpec((tb, tk), lambda i, h: (i, 0)),   # x tile per batch step
            pl.BlockSpec((th, tk), lambda i, h: (h, 0)),   # W tile per hidden step
        ]
        out_specs = pl.BlockSpec((1, tb), lambda i, h: (0, i))  # lane-dense row
        scratch_shapes = [pltpu.VMEM((1, tb), jnp.float32)]
        dim_sem = ("parallel", "arbitrary")
    else:
        kernel = functools.partial(_committee_kernel_3d, act_fn=act_fn,
                                   scale_pre=scale_pre, scale_post=scale_post)
        grid = (n_bt, n_ht, n_kt)
        in_specs = [
            pl.BlockSpec((tb, tk), lambda i, h, k: (i, k)),
            pl.BlockSpec((th, tk), lambda i, h, k: (h, k)),
        ]
        out_specs = pl.BlockSpec((1, tb), lambda i, h, k: (0, i))
        scratch_shapes = [pltpu.VMEM((th, tb), jnp.float32),
                          pltpu.VMEM((1, tb), jnp.float32)]
        dim_sem = ("parallel", "arbitrary", "arbitrary")

    out = pl.pallas_call(
        kernel,
        out_shape=jax.ShapeDtypeStruct((1, b_pad), jnp.float32),
        grid_spec=pltpu.PrefetchScalarGridSpec(
            num_scalar_prefetch=0,
            grid=grid,
            in_specs=in_specs,
            out_specs=out_specs,
            scratch_shapes=scratch_shapes,
        ),
        compiler_params=pltpu.CompilerParams(
            dimension_semantics=dim_sem,
            vmem_limit_bytes=vmem_limit,
        ),
        cost_estimate=cost,
    )(xp, wp)

    return out[0, :B]


def committee_machine_reference(x, W, activation="square"):
    z = (x @ W.T) / math.sqrt(float(x.shape[-1]))
    if activation == "erf":
        a = jax.lax.erf(z / math.sqrt(2.0))
    elif activation == "square":
        a = z * z
    elif activation == "relu":
        a = jnp.maximum(z, 0.0)
    elif activation == "H3":
        a = z * z * z - 3.0 * z
    else:
        raise ValueError(activation)
    return jnp.mean(a, axis=-1)


if __name__ == "__main__":
    key = jax.random.PRNGKey(0)
    k_x1, k_w1, k_x2, k_w2 = jax.random.split(key, 4)

    # ---- Config 1: small shapes, auto tile selection ----------------------
    # B=256 -> 2 batch tiles (megacore), th=H / tk=D -> W DMA'd once, 2D kernel.
    B1, D1, H1 = 256, 64, 32
    x1 = jax.random.normal(k_x1, (B1, D1), dtype=jnp.float32)
    W1 = jax.random.normal(k_w1, (H1, D1), dtype=jnp.float32) / math.sqrt(D1)

    for act in ("square", "erf", "relu", "H3"):
        ref = committee_machine_reference(x1, W1, act)

        out_f32 = jax.block_until_ready(
            committee_machine_forward(x1, W1, act, compute_dtype=jnp.float32))
        assert out_f32.shape == (B1,)
        assert jnp.allclose(out_f32, ref, atol=1e-4, rtol=1e-4), (act, out_f32, ref)

        out_bf16 = jax.block_until_ready(committee_machine_forward(x1, W1, act))
        assert out_bf16.shape == (B1,)
        assert jnp.allclose(out_bf16, ref, atol=5e-2, rtol=5e-2), (act, out_bf16, ref)

    # ---- Config 2: ragged shapes + forced small tiles ----------------------
    # Exercises the 3D (K-tiled) kernel and every padding path
    # (batch 250->256, hidden 24->32, input 200->256).
    B2, D2, H2 = 250, 200, 24
    x2 = jax.random.normal(k_x2, (B2, D2), dtype=jnp.float32)
    W2 = jax.random.normal(k_w2, (H2, D2), dtype=jnp.float32) / math.sqrt(D2)

    for act in ("square", "erf", "relu", "H3"):
        ref = committee_machine_reference(x2, W2, act)
        out = jax.block_until_ready(
            committee_machine_forward(x2, W2, act, compute_dtype=jnp.float32,
                                      _force_tiles=(128, 16, 128)))
        assert out.shape == (B2,)
        assert jnp.allclose(out, ref, atol=1e-4, rtol=1e-4), (act, out, ref)

    print("KERNEL_OK")
</pallas_src>

<mosaic_0001>
module attributes {stable_mosaic.version = 11 : i64} {
  func.func @_committee_kernel_2d(%arg0: i32, %arg1: i32, %arg2: memref<128x64xf32, #tpu.memory_space<vmem>>, %arg3: memref<32x64xf32, #tpu.memory_space<vmem>>, %arg4: memref<1x128xf32, #tpu.memory_space<vmem>>, %arg5: memref<1x128xf32, #tpu.memory_space<vmem>>) attributes {dimension_semantics = [#tpu.dimension_semantics<parallel>, #tpu.dimension_semantics<arbitrary>], iteration_bounds = array<i64: 2, 1>, scalar_prefetch = 0 : i64, scratch_operands = 1 : i64, tpu.core_type = #tpu.core_type<tc>, window_params = [{transform_indices = @transform_0, window_bounds = array<i64: 128, 64>}, {transform_indices = @transform_1, window_bounds = array<i64: 32, 64>}, {transform_indices = @transform_2, window_bounds = array<i64: 1, 128>}]} {
    %c0_i32 = arith.constant 0 : i32
    %0 = arith.cmpi eq, %arg1, %c0_i32 : i32
    %1 = arith.extui %0 : i1 to i32
    %c0_i32_0 = arith.constant 0 : i32
    %2 = arith.cmpi ne, %1, %c0_i32_0 : i32
    scf.if %2 {
      %cst_11 = arith.constant 0.000000e+00 : f32
      %15 = vector.broadcast %cst_11 : f32 to vector<1x128xf32>
      %c0_12 = arith.constant 0 : index
      %c0_13 = arith.constant 0 : index
      %16 = vector.load %arg5[%c0_12, %c0_13] : memref<1x128xf32, #tpu.memory_space<vmem>>, vector<1x128xf32>
      tpu.vector_store %arg5[%c0_12, %c0_13], %15 {strides = array<i32>} : memref<1x128xf32, #tpu.memory_space<vmem>>, vector<1x128xf32>,
    } else {
    }
    %c0 = arith.constant 0 : index
    %c0_1 = arith.constant 0 : index
    %3 = vector.load %arg3[%c0, %c0_1] : memref<32x64xf32, #tpu.memory_space<vmem>>, vector<32x64xf32>
    %c0_2 = arith.constant 0 : index
    %c0_3 = arith.constant 0 : index
    %4 = vector.load %arg2[%c0_2, %c0_3] : memref<128x64xf32, #tpu.memory_space<vmem>>, vector<128x64xf32>
    %cst = arith.constant dense<0.000000e+00> : vector<32x128xf32>
    %5 = tpu.matmul %3, %4, %cst {dimension_numbers = #tpu.dot_dimension_numbers<[1], [1], [0], [0], [0, 0, 1, 0], [], []>} : vector<32x64xf32>, vector<128x64xf32>, vector<32x128xf32> -> vector<32x128xf32>
    %6 = arith.mulf %5, %5 : vector<32x128xf32>
    %c0_4 = arith.constant 0 : index
    %c0_5 = arith.constant 0 : index
    %7 = vector.load %arg5[%c0_4, %c0_5] : memref<1x128xf32, #tpu.memory_space<vmem>>, vector<1x128xf32>
    %cst_6 = arith.constant dense<0.000000e+00> : vector<128xf32>
    %8 = vector.multi_reduction <add>, %6, %cst_6 [0] : vector<32x128xf32> to vector<128xf32>
    %9 = vector.shape_cast %8 : vector<128xf32> to vector<1x128xf32>
    %10 = arith.addf %7, %9 : vector<1x128xf32>
    %c0_7 = arith.constant 0 : index
    %c0_8 = arith.constant 0 : index
    %11 = vector.load %arg5[%c0_7, %c0_8] : memref<1x128xf32, #tpu.memory_space<vmem>>, vector<1x128xf32>
    tpu.vector_store %arg5[%c0_7, %c0_8], %10 {strides = array<i32>} : memref<1x128xf32, #tpu.memory_space<vmem>>, vector<1x128xf32>,
    %c0_i32_9 = arith.constant 0 : i32
    %12 = arith.cmpi eq, %arg1, %c0_i32_9 : i32
    %13 = arith.extui %12 : i1 to i32
    %c0_i32_10 = arith.constant 0 : i32
    %14 = arith.cmpi ne, %13, %c0_i32_10 : i32
    scf.if %14 {
      %c0_11 = arith.constant 0 : index
      %c0_12 = arith.constant 0 : index
      %15 = vector.load %arg5[%c0_11, %c0_12] : memref<1x128xf32, #tpu.memory_space<vmem>>, vector<1x128xf32>
      %cst_13 = arith.constant 4.8828125E-4 : f32
      %16 = vector.broadcast %cst_13 : f32 to vector<1x128xf32>
      %17 = arith.mulf %15, %16 : vector<1x128xf32>
      %c0_14 = arith.constant 0 : index
      %c0_15 = arith.constant 0 : index
      %18 = vector.load %arg4[%c0_14, %c0_15] : memref<1x128xf32, #tpu.memory_space<vmem>>, vector<1x128xf32>
      tpu.vector_store %arg4[%c0_14, %c0_15], %17 {strides = array<i32>} : memref<1x128xf32, #tpu.memory_space<vmem>>, vector<1x128xf32>,
    } else {
    }
    return
  }
  func.func @transform_0(%arg0: i32, %arg1: i32) -> (i32, i32) {
    %c0_i32 = arith.constant 0 : i32
    %c0_i32_0 = arith.constant 0 : i32
    return %arg0, %c0_i32 : i32, i32
  }
  func.func @transform_1(%arg0: i32, %arg1: i32) -> (i32, i32) {
    %c0_i32 = arith.constant 0 : i32
    %c0_i32_0 = arith.constant 0 : i32
    return %arg1, %c0_i32 : i32, i32
  }
  func.func @transform_2(%arg0: i32, %arg1: i32) -> (i32, i32) {
    %c0_i32 = arith.constant 0 : i32
    %c0_i32_0 = arith.constant 0 : i32
    return %c0_i32, %arg0 : i32, i32
  }
}

</mosaic_0001>

<bundles_post_ra>
// kernel: tpu_custom_call.1
= control target key start
LH: loop header
LB: loop body
LE: loop exit
PB: predicated region body
PF: predicated region fallthrough
CT: control target
= control target key end

     0   :  { %7 = vsyncpa [#allocation4], 0  ;;  %s983_s0 = inlined_call_operand.vmem [shape: f32[256,64], index: 0, kind: input, shape index: {}]   ;;  %s984_s1 = inlined_call_operand.vmem [shape: f32[32,64], index: 1, kind: input, shape index: {}]   ;;  %s985_s2 = inlined_call_operand.hbm [shape: f32[1,256], index: 2, kind: output, shape index: {}]  }
   0x1   :  { %9 = vsyncpa [#allocation4 + $0x1], 0  ;;  %s767_s9 = smov 0   ;;  %s769_s10 = smov 0  }
   0x2   :  { %s771_s11 = smov 0   ;;  %s773_s12 = smov 0  }
   0x3   :  { %s775_s13 = smov 0   ;;  %s777_s14 = smov 0  }
   0x4 LB: > { %s461_s15 = sadd.s32 4294967295, %s748_s14   ;;  %s462_s16 = sadd.s32 4294967294, %s748_s14   ;;  %s748_s14 = sphi %s777_s14, %s15_s14   ;;  %s744_s13 = sphi %s775_s13, %s994_s13   ;;  %s740_s12 = sphi %s773_s12, %s993_s12   ;;  %s736_s11 = sphi %s771_s11, %s992_s11   ;;  %s732_s10 = sphi %s769_s10, %s991_s10   ;;  %s728_s9 = sphi %s767_s9, %s990_s9  }
   0x5   : > { %s27_s17 = sadd.s32 1, %s744_s13  ;;  %s86_s18 = sadd.s32 1, %s736_s11 }
   0x6   : > { %p29_p0 = scmp.ge.s32.totalorder %s27_s17, 2  ;;  %p96_p1 = scmp.ne.s32.totalorder %s736_s11, %s732_s10 }
   0x7   : > { %p97_p2 = scmp.eq.s32.totalorder %s461_s15, 1  ;;  %p102_p3 = scmp.ne.s32.totalorder %s732_s10, %s728_s9 }
   0x8   : > { %s996_s17 = smov (%p29_p0, %s27_s17), 0  ;;  %p103_p5 = scmp.eq.s32.totalorder %s462_s16, 1 }
   0x9   : > { %p805_p4 = por %p97_p2, %p96_p1  ;;  %s83_s20 = ssub.s32 %s744_s13, %s996_s17 }
   0xa   : > { %p466_p6 = scmp.ge.s32.totalorder %s748_s14, 1  ;;  %p84_p7 = scmp.eq.s32.totalorder %s83_s20, 0 }
   0xb   : > { %p812_p8 = por %p103_p5, %p102_p3  ;;  %p139_p9 = scmp.lt.s32.totalorder %s748_s14, 3 }
   0xc   : > { %s818_s22 = scalar_select %p84_p7, %s736_s11, %s86_s18  }
   0xd   : > { %p140_p10 = pnand %p466_p6, %p139_p9 }
   0xe   : > { %s820_s23 = sshll.u32 (!%p140_p10), %s740_s12, 4  ;;  %vm202_vm0 = vcmask (!%p140_p10), 523264   ;;  %v182_v0 = vld [vmem:[%s984_s1] sm:$0xff] (!%p140_p10)  ;;  %v184_v1 = vld [vmem:[%s984_s1 + $0x10] sm:$0xff] (!%p140_p10)  ;;  %v183_v27 = vld [vmem:[%s984_s1 + $0x8] sm:$0xff] (!%p140_p10)  ;;  %v750_v29 = vmov (!%p140_p10), 0.0  }
   0xf   : > { %143 = sbr.rel (%p140_p10) target bundleno = 352 (0x160), region = 28  ;;  %p166_p11 = scmp.lt.s32.totalorder (!%p140_p10), %s820_s23, 31  ;;  %544 = vmatprep.mubr.msk.f32.mxu0 (!%p140_p10), %vm202_vm0, %v182_v0  ;;  %547 = vmatprep.mubr.msk.f32.mxu1 (!%p140_p10), %vm202_vm0, %v184_v1  ;;  %vm839_vm1 = vmpackc.low (!%p140_p10), %vm202_vm0, %vm202_vm0  ;;  %v185_v28 = vld [vmem:[%s984_s1 + $0x18] sm:$0xff] (!%p140_p10)  ;;  %181 = vst [vmem:[#allocation2] sm:$0x1] (!%p140_p10), %v750_v29 }
  0x10   : > { %s163_s12 = sand.u32 (!%p140_p10), 1, %s732_s10   ;;  %s936_s24 = scalar_lea.hbm (!%p140_p10), %s985_s2, %s820_s23 }
  0x11   : > { %s164_s15 = scalar_lea.vmem (!%p140_p10), [#allocation3], %s163_s12  ;;  %s371_s25 = scalar_lea.sflag (!%p140_p10), [#allocation4], %s163_s12 }
  0x12   : > { %s383_s16 = sshll.u32 (!%p140_p10), %s164_s15, 4  ;;  %s751_s27 = smov (!%p140_p10), [#allocation3]   ;;  %s938_s16 = int_to_ptr.vmem [resolvable:$true] %s383_s16 }
  0x13   : > { %s670_s26 = scalar_lea.vmem (!%p140_p10), %s938_s16, 16 }
  0x14   : > { %p671_p12 = scmp.ne.s32.totalorder (!%p140_p10), %s938_s16, %s670_s26 }
  0x16   : > { %s167_s28 = scalar_select %p166_p11, %s820_s23, 31  ;;  %v352_v46 = vld [vmem:[#allocation2] sm:$0x1] }
  0x17   : > { %p672_p13 = pnand %p671_p12, %p805_p4 }
  0x18   : > { %s468_s29 = sshll.u32 %s167_s28, 3  ;;  %s674_s28 = sshll.u32 %s751_s27, 4  ;;  %s675_s28 = int_to_ptr.vmem [resolvable:$false] %s674_s28 }
  0x19   : > { %s835_s4 = scalar_lea.vmem %s983_s0, %s468_s29  ;;  %p673_p0 = pneg %p672_p13 }
  0x1a   : > { %v186_v3 = vld [vmem:[%s835_s4] sm:$0xff]  ;;  %v187_v4 = vld [vmem:[%s835_s4 + $0x8] sm:$0xff]  ;;  %v188_v5 = vld [vmem:[%s835_s4 + $0x10] sm:$0xff]  ;;  %s676_s29 = scalar_lea.vmem %s675_s28, 32  ;;  %p677_p1 = scmp.lt.s32.totalorder %s938_s16, %s675_s28 }
  0x1b   : > { %v550_v6 = vpack.c.bf16 %v187_v4, %v186_v3  ;;  %v189_v7 = vld [vmem:[%s835_s4 + $0x18] sm:$0xff]  ;;  %v190_v9 = vld [vmem:[%s835_s4 + $0x20] sm:$0xff]  ;;  %v191_v10 = vld [vmem:[%s835_s4 + $0x28] sm:$0xff]  ;;  %p678_p2 = scmp.lt.s32.totalorder %s676_s29, %s670_s26 }
  0x1c   : > { %v556_v8 = vpack.c.bf16 %v189_v7, %v188_v5  ;;  %v562_v11 = vpack.c.bf16 %v191_v10, %v190_v9  ;;  %v192_v12 = vld [vmem:[%s835_s4 + $0x30] sm:$0xff]  ;;  %v193_v13 = vld [vmem:[%s835_s4 + $0x38] sm:$0xff]  ;;  %v194_v15 = vld [vmem:[%s835_s4 + $0x40] sm:$0xff] }
  0x1d   : > { %552 = vmatprep.subr.msk.bf16.mxu0 %vm839_vm1, %v550_v6  ;;  %598 = vmatprep.subr.msk.bf16.mxu1 %vm839_vm1, %v550_v6  ;;  %v568_v14 = vpack.c.bf16 %v193_v13, %v192_v12  ;;  %v195_v16 = vld [vmem:[%s835_s4 + $0x48] sm:$0xff]  ;;  %v196_v18 = vld [vmem:[%s835_s4 + $0x50] sm:$0xff]  ;;  %v197_v19 = vld [vmem:[%s835_s4 + $0x58] sm:$0xff]  ;;  %p679_p3 = por %p678_p2, %p677_p1 }
  0x1e   : > { %555 = vmatpush3.bf16.xpose.msk.msra.mxu0 %vm839_vm1, %v550_v6  ;;  %606 = vmatpush3.bf16.xpose.msk.msra.mxu1 %vm839_vm1, %v550_v6  ;;  %v574_v17 = vpack.c.bf16 %v195_v16, %v194_v15  ;;  %v580_v20 = vpack.c.bf16 %v197_v19, %v196_v18  ;;  %v198_v21 = vld [vmem:[%s835_s4 + $0x60] sm:$0xff]  ;;  %v199_v22 = vld [vmem:[%s835_s4 + $0x68] sm:$0xff]  ;;  %v200_v24 = vld [vmem:[%s835_s4 + $0x70] sm:$0xff] }
  0x1f   : > { %558 = vmatprep.subr.msk.bf16.mxu0 %vm839_vm1, %v556_v8  ;;  %599 = vmatprep.subr.msk.bf16.mxu1 %vm839_vm1, %v556_v8  ;;  %v586_v23 = vpack.c.bf16 %v199_v22, %v198_v21  ;;  %v201_v25 = vld [vmem:[%s835_s4 + $0x78] sm:$0xff]  ;;  %p680_p5 = pnand %p679_p3, %p673_p0 }
  0x20   : > { %v592_v26 = vpack.c.bf16 %v201_v25, %v200_v24 }
  0x26   : > { %561 = vmatpush3.bf16.xpose.msk.msra.mxu0 %vm839_vm1, %v556_v8  ;;  %607 = vmatpush3.bf16.xpose.msk.msra.mxu1 %vm839_vm1, %v556_v8 }
  0x27   : > { %564 = vmatprep.subr.msk.bf16.mxu0 %vm839_vm1, %v562_v11  ;;  %600 = vmatprep.subr.msk.bf16.mxu1 %vm839_vm1, %v562_v11 }
  0x2e   : > { %567 = vmatpush3.bf16.xpose.msk.msra.mxu0 %vm839_vm1, %v562_v11  ;;  %608 = vmatpush3.bf16.xpose.msk.msra.mxu1 %vm839_vm1, %v562_v11 }
  0x2f   : > { %570 = vmatprep.subr.msk.bf16.mxu0 %vm839_vm1, %v568_v14  ;;  %601 = vmatprep.subr.msk.bf16.mxu1 %vm839_vm1, %v568_v14 }
  0x36   : > { %573 = vmatpush3.bf16.xpose.msk.msra.mxu0 %vm839_vm1, %v568_v14  ;;  %609 = vmatpush3.bf16.xpose.msk.msra.mxu1 %vm839_vm1, %v568_v14 }
  0x37   : > { %576 = vmatprep.subr.msk.bf16.mxu0 %vm839_vm1, %v574_v17  ;;  %602 = vmatprep.subr.msk.bf16.mxu1 %vm839_vm1, %v574_v17 }
  0x3e   : > { %579 = vmatpush3.bf16.xpose.msk.msra.mxu0 %vm839_vm1, %v574_v17  ;;  %610 = vmatpush3.bf16.xpose.msk.msra.mxu1 %vm839_vm1, %v574_v17 }
  0x3f   : > { %582 = vmatprep.subr.msk.bf16.mxu0 %vm839_vm1, %v580_v20  ;;  %603 = vmatprep.subr.msk.bf16.mxu1 %vm839_vm1, %v580_v20 }
  0x46   : > { %585 = vmatpush3.bf16.xpose.msk.msra.mxu0 %vm839_vm1, %v580_v20  ;;  %611 = vmatpush3.bf16.xpose.msk.msra.mxu1 %vm839_vm1, %v580_v20 }
  0x47   : > { %588 = vmatprep.subr.msk.bf16.mxu0 %vm839_vm1, %v586_v23  ;;  %604 = vmatprep.subr.msk.bf16.mxu1 %vm839_vm1, %v586_v23 }
  0x4e   : > { %591 = vmatpush3.bf16.xpose.msk.msra.mxu0 %vm839_vm1, %v586_v23  ;;  %612 = vmatpush3.bf16.xpose.msk.msra.mxu1 %vm839_vm1, %v586_v23 }
  0x4f   : > { %594 = vmatprep.subr.msk.bf16.mxu0 %vm839_vm1, %v592_v26  ;;  %605 = vmatprep.subr.msk.bf16.mxu1 %vm839_vm1, %v592_v26 }
  0x56   : > { %597 = vmatpush3.bf16.xpose.msk.msra.mxu0 %vm839_vm1, %v592_v26  ;;  %613 = vmatpush3.bf16.xpose.msk.msra.mxu1 %vm839_vm1, %v592_v26 }
  0x5d   : > { %545 = vmatmul.mubr.msk.f32.vlgmr.msra.gmra.mrb[0].mxu0 %vm202_vm0, %v183_v27  ;;  %548 = vmatmul.mubr.msk.f32.vlgmr.msra.gmra.mrb[0].mxu1 %vm202_vm0, %v185_v28 }
 0x130   : > { %v546_v30 = vpop.f32.mrb[0].mxu0  ;;  %v549_v31 = vpop.f32.mrb[0].mxu1 }
 0x131   : > { %v349_v32 = vmul.f32 %v546_v30, %v546_v30  ;;  %v329_v33 = vpop.f32.mrb[1].mxu0  ;;  %v339_v34 = vpop.f32.mrb[1].mxu1  ;;  %v351_v38 = vmul.f32 %v549_v31, %v549_v31 }
 0x132   : > { %v348_v35 = vmul.f32 %v329_v33, %v329_v33  ;;  %v350_v36 = vmul.f32 %v339_v34, %v339_v34 }
 0x134   : > { %v353_v37 = vadd.f32 %v349_v32, %v348_v35 }
 0x136   : > { %v354_v39 = vadd.f32 %v353_v37, %v350_v36 }
 0x138   : > { %v355_v40 = vadd.f32 %v354_v39, %v351_v38 }
 0x13a   : > { %v356_v41 = vrot.slane %v355_v40, 4 }
 0x13c   : > { %v357_v42 = vadd.f32 %v356_v41, %v355_v40 }
 0x13e   : > { %v358_v43 = vrot.slane %v357_v42, 2 }
 0x140   : > { %v359_v44 = vadd.f32 %v358_v43, %v357_v42 }
 0x142   : > { %v360_v45 = vrot.slane %v359_v44, 1 }
 0x144   : > { %v361_v47 = vadd.f32 %v360_v45, %v359_v44 }
 0x146   : > { %v362_v48 = vadd.f32 %v361_v47, %v352_v46 }
 0x148   : > { %363 = vst [vmem:[#allocation2] sm:$0x1] %v362_v48 }
 0x14f   : > { %v367_v49 = vld [vmem:[#allocation2] sm:$0x1] }
 0x150   : > { %v368_v50 = vmul.f32 0.00048828125, %v367_v49 }
 0x152   : > { %369 = vst [vmem:[%s164_s15] sm:$0x1] %v368_v50 }
 0x153   : > { %683 = shalt.err (!%p680_p5)
}
 0x154   : > { %s684_s23 = scalar_lea.hbm %s936_s24, 16  ;;  %s688_s4 = scalar_lea.hbm %s985_s2, 32 }
 0x155   : > { %p685_p6 = scmp.ne.s32.totalorder %s936_s24, %s684_s23  ;;  %p689_p10 = scmp.lt.u32.totalorder %s936_s24, %s985_s2 }
 0x156   : > { %p690_p11 = scmp.lt.u32.totalorder %s688_s4, %s684_s23  ;;  %p692_p13 = scmp.lt.u32.totalorder %s684_s23, %s936_s24 }
 0x157   : > { %p686_p7 = pnand %p685_p6, %p805_p4 }
 0x158   : > { %p691_p12 = por %p690_p11, %p689_p10 }
 0x159   : > { %p687_p9 = pneg %p686_p7 }
 0x15a   : > { %p693_p0 = por %p692_p13, %p691_p12 }
 0x15c   : > { %p694_p1 = pnand %p693_p0, %p687_p9 }
 0x15e   : > { %697 = shalt.err (!%p694_p1)
}
 0x15f   : > { %614 = dma.vmem_to_hbm [thread:$0]  (%p805_p4), %s938_s16, 16, %s936_s24, %s371_s25  }
 0x160 PF: > { %p620_p2 = scmp.ge.s32.totalorder %s748_s14, 2  ;;  %s395_s7 = sand.u32 1, %s728_s9  }
 0x161   : > { %s396_s8 = scalar_lea.sflag [#allocation4], %s395_s7 }
 0x162   : > { %p617_p3 = pnand %p620_p2, %p812_p8 }
 0x164   : > { %723 = dma.done.wait (!%p617_p3), %s396_s8, 16  }
 0x165   : > { %725 = vsyncadd (!%p617_p3), %s396_s8, 4294967280  ;;  %s15_s14 = sadd.s32 1, %s748_s14   ;;  %s990_s9 = smov %s732_s10 }
 0x166   : > { %p12_p5 = scmp.ge.s32.totalorder %s15_s14, 4   ;;  %s991_s10 = smov %s736_s11 }
 0x167   : > { %s992_s11 = smov %s818_s22  ;;  %s993_s12 = smov %s744_s13 }
 0x168   : > { %s994_s13 = smov %s996_s17  ;;  %14 = sbr.rel (!%p12_p5) target bundleno = 4 (0x4), region = 74 }
 0x16f   :  { %400 = vsyncpa [#allocation4], 1 }
 0x170   :  { %402 = vsyncpa [#allocation4 + $0x1], 1 }

</bundles_post_ra>
